<compile_context>
chip_gen: v7x
topology: tpu7x:2x2x1
jax: 0.10.0
libtpu: 0.0.40
codegen_flags: <defaults>
</compile_context>

<pallas_src>
import jax
import jax.numpy as jnp
from jax.experimental import pallas as pl
from jax.experimental.pallas import tpu as pltpu


def _round_up(x, m):
    return ((x + m - 1) // m) * m


# --------- Pass 1: tiled conv matmul (bf16 in, f32 acc) + per-tile stats ---------
def _matmul_stats_kernel(cols_ref, w_ref, y_ref, sum_ref, sq_ref):
    k = pl.program_id(2)

    @pl.when(k == 0)
    def _():
        y_ref[...] = jnp.zeros_like(y_ref)

    y_ref[...] += jnp.dot(cols_ref[...], w_ref[...],
                          preferred_element_type=jnp.float32)

    @pl.when(k == pl.num_programs(2) - 1)
    def _():
        y = y_ref[...]
        sum_ref[...] = jnp.sum(y, axis=0, keepdims=True)[None]        # (1,1,tn)
        sq_ref[...] = jnp.sum(y * y, axis=0, keepdims=True)[None]     # (1,1,tn)


# --------- Pass 2: BatchNorm (precomputed scale/shift) + LeakyReLU(0.2) ---------
def _bn_lrelu_kernel(y_ref, scale_ref, shift_ref, out_ref):
    y = y_ref[...] * scale_ref[...] + shift_ref[...]
    out_ref[...] = jnp.maximum(y, 0.2 * y)      # LeakyReLU(0.2)


def standard_conv_block(x_nchw, weight_oihw, bias=None, *,
                        tm_target=512, tk_target=512, tn=128, eps=1e-5):
    """Conv2d(k=4,s=2,p=1) -> BatchNorm2d(affine=False, training stats) -> LeakyReLU(0.2).

    `bias` is accepted for API parity with nn.Conv2d but is not applied: the
    affine-less BatchNorm subtracts the per-channel mean immediately after the
    conv, so any constant per-channel bias cancels exactly.
    """
    del bias
    N, C_in, H, W = x_nchw.shape
    C_out, C_in_w, KH, KW = weight_oihw.shape
    assert C_in_w == C_in and (KH, KW) == (4, 4)
    stride, pad = 2, 1
    H_out = (H + 2 * pad - KH) // stride + 1
    W_out = (W + 2 * pad - KW) // stride + 1

    M = N * H_out * W_out                 # rows of the im2col matrix
    K = KH * KW * C_in                    # contraction length

    # ---- tile sizes (multiples of (8, 128) or full-dim) ----
    tm = min(tm_target, _round_up(M, 8))
    Mp = _round_up(M, tm)
    if K <= tk_target:
        tk, Kp = K, K                     # single K tile (block == full dim)
    else:
        tk = tk_target
        Kp = _round_up(K, tk)
    Cp = _round_up(C_out, tn)             # lane-dense output (pad C_out -> 128k)
    num_m, num_n, num_k = Mp // tm, Cp // tn, Kp // tk

    # ---- im2col (glue, done by XLA) in bf16; zero-pad to tile multiples ----
    x = jnp.transpose(x_nchw, (0, 2, 3, 1))                       # NHWC
    xp = jnp.pad(x, ((0, 0), (pad, pad), (pad, pad), (0, 0)))
    patches = []
    for kh in range(KH):
        for kw in range(KW):
            patches.append(
                xp[:, kh:kh + stride * H_out:stride,
                      kw:kw + stride * W_out:stride, :])
    cols = jnp.concatenate(patches, axis=-1).reshape(M, K).astype(jnp.bfloat16)
    cols = jnp.pad(cols, ((0, Mp - M), (0, Kp - K)))

    # weight (O,I,KH,KW) -> (KH,KW,I,O) -> (K, C_out), matching the patch order.
    w2d = jnp.transpose(weight_oihw, (2, 3, 1, 0)).reshape(K, C_out)
    w2d = jnp.pad(w2d.astype(jnp.bfloat16), ((0, Kp - K), (0, Cp - C_out)))

    # ---- pass 1: conv matmul + per-tile per-channel partial sums ----
    y, sums, sqs = pl.pallas_call(
        _matmul_stats_kernel,
        grid=(num_m, num_n, num_k),
        in_specs=[
            pl.BlockSpec((tm, tk), lambda i, j, k: (i, k)),
            pl.BlockSpec((tk, tn), lambda i, j, k: (k, j)),
        ],
        out_specs=[
            pl.BlockSpec((tm, tn), lambda i, j, k: (i, j)),
            pl.BlockSpec((1, 1, tn), lambda i, j, k: (i, 0, j)),
            pl.BlockSpec((1, 1, tn), lambda i, j, k: (i, 0, j)),
        ],
        out_shape=(
            jax.ShapeDtypeStruct((Mp, Cp), jnp.float32),
            jax.ShapeDtypeStruct((num_m, 1, Cp), jnp.float32),
            jax.ShapeDtypeStruct((num_m, 1, Cp), jnp.float32),
        ),
        compiler_params=pltpu.CompilerParams(
            dimension_semantics=("parallel", "parallel", "arbitrary")),
    )(cols, w2d)

    # ---- tiny reduce in JAX: BatchNorm mean / inv_std (biased var, eps=1e-5).
    # Padded rows/channels contribute exactly zero, so dividing by true M is exact.
    mean = jnp.sum(sums, axis=(0, 1)) / M                          # (Cp,)
    mean_sq = jnp.sum(sqs, axis=(0, 1)) / M
    var = jnp.maximum(mean_sq - mean * mean, 0.0)                  # f32 accumulators
    inv = jax.lax.rsqrt(var + eps)
    scale = inv.reshape(1, Cp).astype(jnp.float32)
    shift = (-mean * inv).reshape(1, Cp).astype(jnp.float32)

    # ---- pass 2: normalize + LeakyReLU (tiled, lane-dense element-wise) ----
    out_flat = pl.pallas_call(
        _bn_lrelu_kernel,
        grid=(num_m, num_n),
        in_specs=[
            pl.BlockSpec((tm, tn), lambda i, j: (i, j)),
            pl.BlockSpec((1, tn), lambda i, j: (0, j)),
            pl.BlockSpec((1, tn), lambda i, j: (0, j)),
        ],
        out_specs=pl.BlockSpec((tm, tn), lambda i, j: (i, j)),
        out_shape=jax.ShapeDtypeStruct((Mp, Cp), jnp.float32),
        compiler_params=pltpu.CompilerParams(
            dimension_semantics=("parallel", "parallel")),
    )(y, scale, shift)

    out = out_flat[:M, :C_out].reshape(N, H_out, W_out, C_out)
    return jnp.transpose(out, (0, 3, 1, 2))                        # back to NCHW


def _reference(x, w, b):
    """Pure-JAX f32 reference of the PyTorch module (training-mode BatchNorm)."""
    y = jax.lax.conv_general_dilated(
        x, w, window_strides=(2, 2), padding=((1, 1), (1, 1)),
        dimension_numbers=("NCHW", "OIHW", "NCHW"))
    y = y + b.reshape(1, -1, 1, 1)
    mean = jnp.mean(y, axis=(0, 2, 3), keepdims=True)
    var = jnp.mean(jnp.square(y - mean), axis=(0, 2, 3), keepdims=True)
    y = (y - mean) / jnp.sqrt(var + 1e-5)
    return jnp.where(y > 0, y, 0.2 * y)


if __name__ == "__main__":
    key = jax.random.PRNGKey(0)
    k_x, k_w, k_b = jax.random.split(key, 3)

    # Small shapes consistent with the module's forward.
    N, C_in, H, W = 2, 4, 16, 16
    C_out = 8

    x = jax.random.normal(k_x, (N, C_in, H, W), dtype=jnp.float32)

    # Deterministic parameter init (shapes as in nn.Conv2d(C_in, C_out, 4, 2, 1)).
    fan_in = C_in * 4 * 4
    bound = 1.0 / (fan_in ** 0.5)
    weight = jax.random.uniform(k_w, (C_out, C_in, 4, 4),
                                minval=-bound, maxval=bound, dtype=jnp.float32)
    bias = jax.random.uniform(k_b, (C_out,),
                              minval=-bound, maxval=bound, dtype=jnp.float32)

    fwd = jax.jit(standard_conv_block)
    out = jax.block_until_ready(fwd(x, weight, bias))

    ref = _reference(x, weight, bias)
    assert out.shape == (N, C_out, H // 2, W // 2), out.shape
    max_err = float(jnp.max(jnp.abs(out - ref)))
    # bf16 MXU inputs with f32 accumulation -> a few 1e-3 abs error post-BN.
    assert jnp.allclose(out, ref, atol=2e-2, rtol=2e-2), max_err
    print("KERNEL_OK")
</pallas_src>

<mosaic_0001>
module attributes {stable_mosaic.version = 11 : i64} {
  func.func @_bn_lrelu_kernel(%arg0: i32, %arg1: i32, %arg2: memref<128x128xf32, #tpu.memory_space<vmem>>, %arg3: memref<1x128xf32, #tpu.memory_space<vmem>>, %arg4: memref<1x128xf32, #tpu.memory_space<vmem>>, %arg5: memref<128x128xf32, #tpu.memory_space<vmem>>) attributes {dimension_semantics = [#tpu.dimension_semantics<parallel>, #tpu.dimension_semantics<parallel>], iteration_bounds = array<i64: 1, 1>, scalar_prefetch = 0 : i64, scratch_operands = 0 : i64, tpu.core_type = #tpu.core_type<tc>, window_params = [{transform_indices = @transform_0, window_bounds = array<i64: 128, 128>}, {transform_indices = @transform_1, window_bounds = array<i64: 1, 128>}, {transform_indices = @transform_2, window_bounds = array<i64: 1, 128>}, {transform_indices = @transform_3, window_bounds = array<i64: 128, 128>}]} {
    %c0 = arith.constant 0 : index
    %c0_0 = arith.constant 0 : index
    %0 = vector.load %arg2[%c0, %c0_0] : memref<128x128xf32, #tpu.memory_space<vmem>>, vector<128x128xf32>
    %c0_1 = arith.constant 0 : index
    %c0_2 = arith.constant 0 : index
    %1 = vector.load %arg3[%c0_1, %c0_2] : memref<1x128xf32, #tpu.memory_space<vmem>>, vector<1x128xf32>
    %2 = vector.broadcast %1 : vector<1x128xf32> to vector<128x128xf32>
    %3 = arith.mulf %0, %2 : vector<128x128xf32>
    %c0_3 = arith.constant 0 : index
    %c0_4 = arith.constant 0 : index
    %4 = vector.load %arg4[%c0_3, %c0_4] : memref<1x128xf32, #tpu.memory_space<vmem>>, vector<1x128xf32>
    %5 = vector.broadcast %4 : vector<1x128xf32> to vector<128x128xf32>
    %6 = arith.addf %3, %5 : vector<128x128xf32>
    %cst = arith.constant 2.000000e-01 : f32
    %7 = vector.broadcast %cst : f32 to vector<128x128xf32>
    %8 = arith.mulf %7, %6 : vector<128x128xf32>
    %9 = arith.maximumf %6, %8 : vector<128x128xf32>
    %c0_5 = arith.constant 0 : index
    %c0_6 = arith.constant 0 : index
    %10 = vector.load %arg5[%c0_5, %c0_6] : memref<128x128xf32, #tpu.memory_space<vmem>>, vector<128x128xf32>
    tpu.vector_store %arg5[%c0_5, %c0_6], %9 {strides = array<i32>} : memref<128x128xf32, #tpu.memory_space<vmem>>, vector<128x128xf32>,
    return
  }
  func.func @transform_0(%arg0: i32, %arg1: i32) -> (i32, i32) {
    %c0_i32 = arith.constant 0 : i32
    return %arg0, %arg1 : i32, i32
  }
  func.func @transform_1(%arg0: i32, %arg1: i32) -> (i32, i32) {
    %c0_i32 = arith.constant 0 : i32
    %c0_i32_0 = arith.constant 0 : i32
    return %c0_i32, %arg1 : i32, i32
  }
  func.func @transform_2(%arg0: i32, %arg1: i32) -> (i32, i32) {
    %c0_i32 = arith.constant 0 : i32
    %c0_i32_0 = arith.constant 0 : i32
    return %c0_i32, %arg1 : i32, i32
  }
  func.func @transform_3(%arg0: i32, %arg1: i32) -> (i32, i32) {
    %c0_i32 = arith.constant 0 : i32
    return %arg0, %arg1 : i32, i32
  }
}

module attributes {stable_mosaic.version = 11 : i64} {
  func.func @_matmul_stats_kernel(%arg0: i32, %arg1: i32, %arg2: i32, %arg3: memref<128x64xbf16, #tpu.memory_space<vmem>>, %arg4: memref<64x128xbf16, #tpu.memory_space<vmem>>, %arg5: memref<128x128xf32, #tpu.memory_space<vmem>>, %arg6: memref<1x1x128xf32, #tpu.memory_space<vmem>>, %arg7: memref<1x1x128xf32, #tpu.memory_space<vmem>>) attributes {dimension_semantics = [#tpu.dimension_semantics<parallel>, #tpu.dimension_semantics<parallel>, #tpu.dimension_semantics<arbitrary>], iteration_bounds = array<i64: 1, 1, 1>, scalar_prefetch = 0 : i64, scratch_operands = 0 : i64, tpu.core_type = #tpu.core_type<tc>, window_params = [{transform_indices = @transform_0, window_bounds = array<i64: 128, 64>}, {transform_indices = @transform_1, window_bounds = array<i64: 64, 128>}, {transform_indices = @transform_2, window_bounds = array<i64: 128, 128>}, {transform_indices = @transform_3, window_bounds = array<i64: 1, 1, 128>}, {transform_indices = @transform_4, window_bounds = array<i64: 1, 1, 128>}]} {
    %c0_i32 = arith.constant 0 : i32
    %0 = arith.cmpi eq, %arg2, %c0_i32 : i32
    %1 = arith.extui %0 : i1 to i32
    %c0_i32_0 = arith.constant 0 : i32
    %2 = arith.cmpi ne, %1, %c0_i32_0 : i32
    scf.if %2 {
      %cst_10 = arith.constant 0.000000e+00 : f32
      %12 = vector.broadcast %cst_10 : f32 to vector<128x128xf32>
      %c0_11 = arith.constant 0 : index
      %c0_12 = arith.constant 0 : index
      %13 = vector.load %arg5[%c0_11, %c0_12] : memref<128x128xf32, #tpu.memory_space<vmem>>, vector<128x128xf32>
      tpu.vector_store %arg5[%c0_11, %c0_12], %12 {strides = array<i32>} : memref<128x128xf32, #tpu.memory_space<vmem>>, vector<128x128xf32>,
    } else {
    }
    %c0 = arith.constant 0 : index
    %c0_1 = arith.constant 0 : index
    %3 = vector.load %arg5[%c0, %c0_1] : memref<128x128xf32, #tpu.memory_space<vmem>>, vector<128x128xf32>
    %c0_2 = arith.constant 0 : index
    %c0_3 = arith.constant 0 : index
    %4 = vector.load %arg3[%c0_2, %c0_3] : memref<128x64xbf16, #tpu.memory_space<vmem>>, vector<128x64xbf16>
    %c0_4 = arith.constant 0 : index
    %c0_5 = arith.constant 0 : index
    %5 = vector.load %arg4[%c0_4, %c0_5] : memref<64x128xbf16, #tpu.memory_space<vmem>>, vector<64x128xbf16>
    %cst = arith.constant dense<0.000000e+00> : vector<128x128xf32>
    %6 = tpu.matmul %4, %5, %cst {dimension_numbers = #tpu.dot_dimension_numbers<[1], [0], [0], [1], [0, 0, 1, 1], [], []>} : vector<128x64xbf16>, vector<64x128xbf16>, vector<128x128xf32> -> vector<128x128xf32>
    %7 = arith.addf %3, %6 : vector<128x128xf32>
    %c0_6 = arith.constant 0 : index
    %c0_7 = arith.constant 0 : index
    %8 = vector.load %arg5[%c0_6, %c0_7] : memref<128x128xf32, #tpu.memory_space<vmem>>, vector<128x128xf32>
    tpu.vector_store %arg5[%c0_6, %c0_7], %7 {strides = array<i32>} : memref<128x128xf32, #tpu.memory_space<vmem>>, vector<128x128xf32>,
    %c0_i32_8 = arith.constant 0 : i32
    %9 = arith.cmpi eq, %arg2, %c0_i32_8 : i32
    %10 = arith.extui %9 : i1 to i32
    %c0_i32_9 = arith.constant 0 : i32
    %11 = arith.cmpi ne, %10, %c0_i32_9 : i32
    scf.if %11 {
      %c0_10 = arith.constant 0 : index
      %c0_11 = arith.constant 0 : index
      %12 = vector.load %arg5[%c0_10, %c0_11] : memref<128x128xf32, #tpu.memory_space<vmem>>, vector<128x128xf32>
      %cst_12 = arith.constant dense<0.000000e+00> : vector<128xf32>
      %13 = vector.multi_reduction <add>, %12, %cst_12 [0] : vector<128x128xf32> to vector<128xf32>
      %14 = vector.shape_cast %13 : vector<128xf32> to vector<1x128xf32>
      %15 = vector.shape_cast %14 : vector<1x128xf32> to vector<1x1x128xf32>
      %c0_13 = arith.constant 0 : index
      %c0_14 = arith.constant 0 : index
      %c0_15 = arith.constant 0 : index
      %16 = vector.load %arg6[%c0_13, %c0_14, %c0_15] : memref<1x1x128xf32, #tpu.memory_space<vmem>>, vector<1x1x128xf32>
      tpu.vector_store %arg6[%c0_13, %c0_14, %c0_15], %15 {strides = array<i32>} : memref<1x1x128xf32, #tpu.memory_space<vmem>>, vector<1x1x128xf32>,
      %17 = arith.mulf %12, %12 : vector<128x128xf32>
      %cst_16 = arith.constant dense<0.000000e+00> : vector<128xf32>
      %18 = vector.multi_reduction <add>, %17, %cst_16 [0] : vector<128x128xf32> to vector<128xf32>
      %19 = vector.shape_cast %18 : vector<128xf32> to vector<1x128xf32>
      %20 = vector.shape_cast %19 : vector<1x128xf32> to vector<1x1x128xf32>
      %c0_17 = arith.constant 0 : index
      %c0_18 = arith.constant 0 : index
      %c0_19 = arith.constant 0 : index
      %21 = vector.load %arg7[%c0_17, %c0_18, %c0_19] : memref<1x1x128xf32, #tpu.memory_space<vmem>>, vector<1x1x128xf32>
      tpu.vector_store %arg7[%c0_17, %c0_18, %c0_19], %20 {strides = array<i32>} : memref<1x1x128xf32, #tpu.memory_space<vmem>>, vector<1x1x128xf32>,
    } else {
    }
    return
  }
  func.func @transform_0(%arg0: i32, %arg1: i32, %arg2: i32) -> (i32, i32) {
    %c0_i32 = arith.constant 0 : i32
    return %arg0, %arg2 : i32, i32
  }
  func.func @transform_1(%arg0: i32, %arg1: i32, %arg2: i32) -> (i32, i32) {
    %c0_i32 = arith.constant 0 : i32
    return %arg2, %arg1 : i32, i32
  }
  func.func @transform_2(%arg0: i32, %arg1: i32, %arg2: i32) -> (i32, i32) {
    %c0_i32 = arith.constant 0 : i32
    return %arg0, %arg1 : i32, i32
  }
  func.func @transform_3(%arg0: i32, %arg1: i32, %arg2: i32) -> (i32, i32, i32) {
    %c0_i32 = arith.constant 0 : i32
    %c0_i32_0 = arith.constant 0 : i32
    return %arg0, %c0_i32, %arg1 : i32, i32, i32
  }
  func.func @transform_4(%arg0: i32, %arg1: i32, %arg2: i32) -> (i32, i32, i32) {
    %c0_i32 = arith.constant 0 : i32
    %c0_i32_0 = arith.constant 0 : i32
    return %arg0, %c0_i32, %arg1 : i32, i32, i32
  }
}

</mosaic_0001>

<bundles_post_ra>
// kernel: standard_conv_block.3
= control target key start
LH: loop header
LB: loop body
LE: loop exit
PB: predicated region body
PF: predicated region fallthrough
CT: control target
= control target key end

     0   :  { %s288_s0 = inlined_call_operand.vmem [shape: f32[128,128], index: 0, kind: input, shape index: {}]   ;;  %s289_s1 = inlined_call_operand.vmem [shape: f32[1,128], index: 1, kind: input, shape index: {}]   ;;  %s290_s2 = inlined_call_operand.vmem [shape: f32[1,128], index: 2, kind: input, shape index: {}]   ;;  %s291_s3 = inlined_call_operand.vmem [shape: f32[128,128], index: 3, kind: output, shape index: {}]  }
   0x1   :  { %v14_v0 = vld [vmem:[%s288_s0] sm:$0xff]  ;;  %v15_v4 = vld [vmem:[%s288_s0 + $0x8] sm:$0xff]  ;;  %v16_v5 = vld [vmem:[%s288_s0 + $0x10] sm:$0xff] }
   0x2   :  { %v156_v1 = vld [vmem:[%s289_s1] ss:$0 sm:$0xff]  ;;  %v17_v6 = vld [vmem:[%s288_s0 + $0x18] sm:$0xff]  ;;  %v19_v11 = vld [vmem:[%s288_s0 + $0x28] sm:$0xff] }
   0x3   :  { %v161_v2 = vld [vmem:[%s290_s2] ss:$0 sm:$0xff]  ;;  %v37_v3 = vmul.f32 %v156_v1, %v14_v0  ;;  %v38_v7 = vmul.f32 %v156_v1, %v15_v4  ;;  %v39_v8 = vmul.f32 %v156_v1, %v16_v5  ;;  %v40_v9 = vmul.f32 %v156_v1, %v17_v6  ;;  %v20_v12 = vld [vmem:[%s288_s0 + $0x30] sm:$0xff]  ;;  %v21_v17 = vld [vmem:[%s288_s0 + $0x38] sm:$0xff] }
   0x4   :  { %v18_v10 = vld [vmem:[%s288_s0 + $0x20] sm:$0xff]  ;;  %v42_v15 = vmul.f32 %v156_v1, %v19_v11  ;;  %v43_v16 = vmul.f32 %v156_v1, %v20_v12  ;;  %v44_v21 = vmul.f32 %v156_v1, %v21_v17  ;;  %v23_v27 = vld [vmem:[%s288_s0 + $0x48] sm:$0xff]  ;;  %v24_v28 = vld [vmem:[%s288_s0 + $0x50] sm:$0xff] }
   0x5   :  { %v60_v13 = vadd.f32 %v161_v2, %v37_v3  ;;  %v41_v14 = vmul.f32 %v156_v1, %v18_v10  ;;  %v61_v18 = vadd.f32 %v161_v2, %v38_v7  ;;  %v62_v19 = vadd.f32 %v161_v2, %v39_v8  ;;  %v22_v22 = vld [vmem:[%s288_s0 + $0x40] sm:$0xff]  ;;  %v25_v29 = vld [vmem:[%s288_s0 + $0x58] sm:$0xff]  ;;  %v27_v43 = vld [vmem:[%s288_s0 + $0x68] sm:$0xff] }
   0x6   :  { %v63_v20 = vadd.f32 %v161_v2, %v40_v9  ;;  %v65_v25 = vadd.f32 %v161_v2, %v42_v15  ;;  %v66_v26 = vadd.f32 %v161_v2, %v43_v16  ;;  %v67_v33 = vadd.f32 %v161_v2, %v44_v21  ;;  %v26_v42 = vld [vmem:[%s288_s0 + $0x60] sm:$0xff]  ;;  %v28_v44 = vld [vmem:[%s288_s0 + $0x70] sm:$0xff]  ;;  %v29_v49 = vld [vmem:[%s288_s0 + $0x78] sm:$0xff] }
   0x7   :  { %v76_v23 = vmul.f32 0.2, %v60_v13  ;;  %v64_v24 = vadd.f32 %v161_v2, %v41_v14  ;;  %v77_v30 = vmul.f32 0.2, %v61_v18  ;;  %v78_v31 = vmul.f32 0.2, %v62_v19 }
   0x8   :  { %v79_v32 = vmul.f32 0.2, %v63_v20  ;;  %v81_v36 = vmul.f32 0.2, %v65_v25  ;;  %v82_v37 = vmul.f32 0.2, %v66_v26  ;;  %v45_v48 = vmul.f32 %v156_v1, %v22_v22 }
   0x9   :  { %v92_v34 = vmax.f32 %v60_v13, %v76_v23  ;;  %v80_v35 = vmul.f32 0.2, %v64_v24  ;;  %v93_v38 = vmax.f32 %v61_v18, %v77_v30  ;;  %v94_v39 = vmax.f32 %v62_v19, %v78_v31 }
   0xa   :  { %v95_v40 = vmax.f32 %v63_v20, %v79_v32  ;;  %v83_v41 = vmul.f32 0.2, %v67_v33  ;;  %v97_v46 = vmax.f32 %v65_v25, %v81_v36  ;;  %v98_v47 = vmax.f32 %v66_v26, %v82_v37 }
   0xb   :  { %108 = vst [vmem:[%s291_s3] sm:$0xff] %v92_v34  ;;  %v96_v45 = vmax.f32 %v64_v24, %v80_v35  ;;  %109 = vst [vmem:[%s291_s3 + $0x8] sm:$0xff] %v93_v38  ;;  %v46_v51 = vmul.f32 %v156_v1, %v23_v27  ;;  %v47_v52 = vmul.f32 %v156_v1, %v24_v28 }
   0xc   :  { %110 = vst [vmem:[%s291_s3 + $0x10] sm:$0xff] %v94_v39  ;;  %111 = vst [vmem:[%s291_s3 + $0x18] sm:$0xff] %v95_v40  ;;  %v99_v50 = vmax.f32 %v67_v33, %v83_v41  ;;  %v48_v53 = vmul.f32 %v156_v1, %v25_v29  ;;  %v68_v54 = vadd.f32 %v161_v2, %v45_v48 }
   0xd   :  { %112 = vst [vmem:[%s291_s3 + $0x20] sm:$0xff] %v96_v45  ;;  %113 = vst [vmem:[%s291_s3 + $0x28] sm:$0xff] %v97_v46  ;;  %v49_v55 = vmul.f32 %v156_v1, %v26_v42  ;;  %v50_v56 = vmul.f32 %v156_v1, %v27_v43  ;;  %v51_v57 = vmul.f32 %v156_v1, %v28_v44 }
   0xe   :  { %114 = vst [vmem:[%s291_s3 + $0x30] sm:$0xff] %v98_v47  ;;  %115 = vst [vmem:[%s291_s3 + $0x38] sm:$0xff] %v99_v50  ;;  %v69_v58 = vadd.f32 %v161_v2, %v46_v51  ;;  %v70_v59 = vadd.f32 %v161_v2, %v47_v52  ;;  %v71_v60 = vadd.f32 %v161_v2, %v48_v53  ;;  %v84_v62 = vmul.f32 0.2, %v68_v54 }
   0xf   :  { %v52_v61 = vmul.f32 %v156_v1, %v29_v49  ;;  %v72_v63 = vadd.f32 %v161_v2, %v49_v55  ;;  %v73_v0 = vadd.f32 %v161_v2, %v50_v56  ;;  %v74_v3 = vadd.f32 %v161_v2, %v51_v57 }
  0x10   :  { %v85_v4 = vmul.f32 0.2, %v69_v58  ;;  %v86_v5 = vmul.f32 0.2, %v70_v59  ;;  %v87_v6 = vmul.f32 0.2, %v71_v60  ;;  %v100_v8 = vmax.f32 %v68_v54, %v84_v62 }
  0x11   :  { %v75_v7 = vadd.f32 %v161_v2, %v52_v61  ;;  %v88_v9 = vmul.f32 0.2, %v72_v63  ;;  %v89_v10 = vmul.f32 0.2, %v73_v0  ;;  %v90_v11 = vmul.f32 0.2, %v74_v3 }
  0x12   :  { %v101_v12 = vmax.f32 %v69_v58, %v85_v4  ;;  %v102_v13 = vmax.f32 %v70_v59, %v86_v5  ;;  %v103_v14 = vmax.f32 %v71_v60, %v87_v6  ;;  %116 = vst [vmem:[%s291_s3 + $0x40] sm:$0xff] %v100_v8 }
  0x13   :  { %v91_v1 = vmul.f32 0.2, %v75_v7  ;;  %v104_v15 = vmax.f32 %v72_v63, %v88_v9  ;;  %v105_v16 = vmax.f32 %v73_v0, %v89_v10  ;;  %v106_v17 = vmax.f32 %v74_v3, %v90_v11 }
  0x14   :  { %117 = vst [vmem:[%s291_s3 + $0x48] sm:$0xff] %v101_v12  ;;  %118 = vst [vmem:[%s291_s3 + $0x50] sm:$0xff] %v102_v13 }
  0x15   :  { %119 = vst [vmem:[%s291_s3 + $0x58] sm:$0xff] %v103_v14  ;;  %v107_v2 = vmax.f32 %v75_v7, %v91_v1  ;;  %120 = vst [vmem:[%s291_s3 + $0x60] sm:$0xff] %v104_v15 }
  0x16   :  { %121 = vst [vmem:[%s291_s3 + $0x68] sm:$0xff] %v105_v16  ;;  %122 = vst [vmem:[%s291_s3 + $0x70] sm:$0xff] %v106_v17 }
  0x17   :  { %123 = vst [vmem:[%s291_s3 + $0x78] sm:$0xff] %v107_v2 }

// kernel: standard_conv_block.2
= control target key start
LH: loop header
LB: loop body
LE: loop exit
PB: predicated region body
PF: predicated region fallthrough
CT: control target
= control target key end

     0   :  { %vm139_vm0 = vcmask 523264   ;;  %s584_s1 = inlined_call_operand.vmem [shape: bf16[64,128], index: 1, kind: input, shape index: {}]   ;;  %s585_s0 = inlined_call_operand.vmem [shape: bf16[128,64], index: 0, kind: input, shape index: {}]   ;;  %s586_s2 = inlined_call_operand.vmem [shape: f32[128,128], index: 2, kind: output, shape index: {0}]   ;;  %s587_s3 = inlined_call_operand.vmem [shape: f32[1,1,128], index: 3, kind: output, shape index: {1}]   ;;  %s588_s4 = inlined_call_operand.vmem [shape: f32[1,1,128], index: 4, kind: output, shape index: {2}]  }
   0x1   :  { %v449_v0 = vld [vmem:[%s584_s1] sm:$0xff]   ;;  %v450_v1 = vld [vmem:[%s584_s1 + $0x8] sm:$0xff]   ;;  %v451_v2 = vld [vmem:[%s584_s1 + $0x10] sm:$0xff]  }
   0x2   :  { %416 = vmatprep.subr.bf16.mxu0 %v449_v0  ;;  %440 = vmatprep.subr.bf16.mxu1 %v449_v0  ;;  %v453_v3 = vld [vmem:[%s585_s0] sm:$0xff]   ;;  %v452_v4 = vld [vmem:[%s584_s1 + $0x18] sm:$0xff]   ;;  %v454_v6 = vld [vmem:[%s585_s0 + $0x8] sm:$0xff]  }
   0x3   :  { %417 = vmatpush3.bf16.msra.mxu0 %v449_v0  ;;  %444 = vmatpush3.bf16.msra.mxu1 %v449_v0  ;;  %v457_v5 = vld [vmem:[%s585_s0 + $0x20] sm:$0xff]   ;;  %v458_v7 = vld [vmem:[%s585_s0 + $0x28] sm:$0xff]   ;;  %v455_v8 = vld [vmem:[%s585_s0 + $0x10] sm:$0xff]  }
   0x4   :  { %418 = vmatprep.subr.bf16.mxu0 %v450_v1  ;;  %441 = vmatprep.subr.bf16.mxu1 %v450_v1  ;;  %v459_v9 = vld [vmem:[%s585_s0 + $0x30] sm:$0xff]   ;;  %v456_v10 = vld [vmem:[%s585_s0 + $0x18] sm:$0xff]  }
   0x5   :  { %424 = vmatprep.mubr.msk.bf16.mxu0 %vm139_vm0, %v453_v3  ;;  %432 = vmatprep.mubr.msk.bf16.mxu1 %vm139_vm0, %v457_v5  ;;  %v460_v11 = vld [vmem:[%s585_s0 + $0x38] sm:$0xff]  }
   0x7   :  { %419 = vmatpush3.bf16.msra.mxu0 %v450_v1  ;;  %445 = vmatpush3.bf16.msra.mxu1 %v450_v1 }
   0x8   :  { %420 = vmatprep.subr.bf16.mxu0 %v451_v2  ;;  %442 = vmatprep.subr.bf16.mxu1 %v451_v2 }
   0xb   :  { %421 = vmatpush3.bf16.msra.mxu0 %v451_v2  ;;  %446 = vmatpush3.bf16.msra.mxu1 %v451_v2 }
   0xc   :  { %422 = vmatprep.subr.bf16.mxu0 %v452_v4  ;;  %443 = vmatprep.subr.bf16.mxu1 %v452_v4 }
   0xf   :  { %423 = vmatpush3.bf16.msra.mxu0 %v452_v4  ;;  %447 = vmatpush3.bf16.msra.mxu1 %v452_v4 }
  0x12   :  { %425 = vmatmul.mubr.msk.bf16.vlgmr.msra.gmra.mrb[0].mxu0 %vm139_vm0, %v454_v6  ;;  %433 = vmatmul.mubr.msk.bf16.vlgmr.msra.gmra.mrb[0].mxu1 %vm139_vm0, %v458_v7 }
  0x13   :  { %428 = vmatprep.mubr.msk.bf16.mxu0 %vm139_vm0, %v455_v8  ;;  %436 = vmatprep.mubr.msk.bf16.mxu1 %vm139_vm0, %v459_v9 }
  0x1a   :  { %429 = vmatmul.mubr.msk.bf16.gmra.mrb[4].mxu0 %vm139_vm0, %v456_v10  ;;  %437 = vmatmul.mubr.msk.bf16.gmra.mrb[4].mxu1 %vm139_vm0, %v460_v11 }
  0xe5   :  { %v426_v12 = vpop.f32.mrb[0].mxu0  ;;  %v434_v13 = vpop.f32.mrb[0].mxu1 }
  0xe6   :  { %v198_v14 = vpop.f32.mrb[1].mxu0  ;;  %v230_v15 = vpop.f32.mrb[1].mxu1  ;;  %279 = vst [vmem:[%s586_s2 + $0x10] sm:$0xff] %v426_v12  ;;  %287 = vst [vmem:[%s586_s2 + $0x50] sm:$0xff] %v434_v13  ;;  %v336_v23 = vmul.f32 %v426_v12, %v426_v12  ;;  %v344_v55 = vmul.f32 %v434_v13, %v434_v13 }
  0xe7   :  { %v427_v16 = vpop.f32.mrb[2].mxu0  ;;  %v435_v17 = vpop.f32.mrb[2].mxu1  ;;  %277 = vst [vmem:[%s586_s2] sm:$0xff] %v198_v14  ;;  %285 = vst [vmem:[%s586_s2 + $0x40] sm:$0xff] %v230_v15  ;;  %v334_v20 = vmul.f32 %v198_v14, %v198_v14  ;;  %v342_v49 = vmul.f32 %v230_v15, %v230_v15 }
  0xe8   :  { %v201_v18 = vpop.f32.mrb[3].mxu0  ;;  %v233_v19 = vpop.f32.mrb[3].mxu1  ;;  %280 = vst [vmem:[%s586_s2 + $0x18] sm:$0xff] %v427_v16  ;;  %288 = vst [vmem:[%s586_s2 + $0x58] sm:$0xff] %v435_v17  ;;  %v337_v28 = vmul.f32 %v427_v16, %v427_v16  ;;  %v345_v58 = vmul.f32 %v435_v17, %v435_v17 }
  0xe9   :  { %278 = vst [vmem:[%s586_s2 + $0x8] sm:$0xff] %v201_v18  ;;  %v312_v21 = vadd.f32 %v201_v18, %v198_v14  ;;  %v335_v22 = vmul.f32 %v201_v18, %v201_v18  ;;  %286 = vst [vmem:[%s586_s2 + $0x48] sm:$0xff] %v233_v19  ;;  %v343_v54 = vmul.f32 %v233_v19, %v233_v19 }
  0xeb   :  { %v313_v24 = vadd.f32 %v426_v12, %v312_v21  ;;  %v350_v25 = vadd.f32 %v335_v22, %v334_v20 }
  0xed   :  { %v430_v26 = vpop.f32.mrb[4].mxu0  ;;  %v438_v27 = vpop.f32.mrb[4].mxu1  ;;  %v351_v31 = vadd.f32 %v350_v25, %v336_v23  ;;  %v314_v32 = vadd.f32 %v427_v16, %v313_v24 }
  0xee   :  { %v214_v29 = vpop.f32.mrb[5].mxu0  ;;  %v246_v30 = vpop.f32.mrb[5].mxu1  ;;  %283 = vst [vmem:[%s586_s2 + $0x30] sm:$0xff] %v430_v26  ;;  %291 = vst [vmem:[%s586_s2 + $0x70] sm:$0xff] %v438_v27  ;;  %v340_v43 = vmul.f32 %v430_v26, %v430_v26  ;;  %v348_v3 = vmul.f32 %v438_v27, %v438_v27 }
  0xef   :  { %v431_v33 = vpop.f32.mrb[6].mxu0  ;;  %v439_v34 = vpop.f32.mrb[6].mxu1  ;;  %281 = vst [vmem:[%s586_s2 + $0x20] sm:$0xff] %v214_v29  ;;  %v315_v37 = vadd.f32 %v314_v32, %v214_v29  ;;  %v338_v38 = vmul.f32 %v214_v29, %v214_v29  ;;  %v352_v39 = vadd.f32 %v351_v31, %v337_v28  ;;  %289 = vst [vmem:[%s586_s2 + $0x60] sm:$0xff] %v246_v30 }
  0xf0   :  { %v217_v35 = vpop.f32.mrb[7].mxu0  ;;  %v249_v36 = vpop.f32.mrb[7].mxu1  ;;  %284 = vst [vmem:[%s586_s2 + $0x38] sm:$0xff] %v431_v33  ;;  %292 = vst [vmem:[%s586_s2 + $0x78] sm:$0xff] %v439_v34  ;;  %v341_v46 = vmul.f32 %v431_v33, %v431_v33  ;;  %v346_v61 = vmul.f32 %v246_v30, %v246_v30  ;;  %v349_v6 = vmul.f32 %v439_v34, %v439_v34 }
  0xf1   :  { %v353_v40 = vadd.f32 %v352_v39, %v338_v38  ;;  %282 = vst [vmem:[%s586_s2 + $0x28] sm:$0xff] %v217_v35  ;;  %v316_v41 = vadd.f32 %v315_v37, %v217_v35  ;;  %v339_v42 = vmul.f32 %v217_v35, %v217_v35  ;;  %290 = vst [vmem:[%s586_s2 + $0x68] sm:$0xff] %v249_v36 }
  0xf2   :  { %v347_v2 = vmul.f32 %v249_v36, %v249_v36 }
  0xf3   :  { %v317_v44 = vadd.f32 %v430_v26, %v316_v41  ;;  %v354_v45 = vadd.f32 %v353_v40, %v339_v42 }
  0xf5   :  { %v355_v47 = vadd.f32 %v354_v45, %v340_v43  ;;  %v318_v48 = vadd.f32 %v431_v33, %v317_v44 }
  0xf7   :  { %v319_v50 = vadd.f32 %v318_v48, %v230_v15  ;;  %v356_v51 = vadd.f32 %v355_v47, %v341_v46 }
  0xf9   :  { %v357_v52 = vadd.f32 %v356_v51, %v342_v49  ;;  %v320_v53 = vadd.f32 %v319_v50, %v233_v19 }
  0xfb   :  { %v321_v56 = vadd.f32 %v434_v13, %v320_v53  ;;  %v358_v57 = vadd.f32 %v357_v52, %v343_v54 }
  0xfd   :  { %v359_v59 = vadd.f32 %v358_v57, %v344_v55  ;;  %v322_v60 = vadd.f32 %v435_v17, %v321_v56 }
  0xff   :  { %v323_v62 = vadd.f32 %v322_v60, %v246_v30  ;;  %v360_v63 = vadd.f32 %v359_v59, %v345_v58 }
 0x101   :  { %v361_v0 = vadd.f32 %v360_v63, %v346_v61  ;;  %v324_v1 = vadd.f32 %v323_v62, %v249_v36 }
 0x103   :  { %v325_v4 = vadd.f32 %v438_v27, %v324_v1  ;;  %v362_v5 = vadd.f32 %v361_v0, %v347_v2 }
 0x105   :  { %v326_v7 = vadd.f32 %v439_v34, %v325_v4  ;;  %v363_v8 = vadd.f32 %v362_v5, %v348_v3 }
 0x107   :  { %v327_v9 = vrot.slane %v326_v7, 4  ;;  %v364_v10 = vadd.f32 %v363_v8, %v349_v6 }
 0x109   :  { %v328_v11 = vadd.f32 %v327_v9, %v326_v7  ;;  %v365_v12 = vrot.slane %v364_v10, 4 }
 0x10b   :  { %v329_v13 = vrot.slane %v328_v11, 2  ;;  %v366_v14 = vadd.f32 %v365_v12, %v364_v10 }
 0x10d   :  { %v330_v15 = vadd.f32 %v329_v13, %v328_v11  ;;  %v367_v16 = vrot.slane %v366_v14, 2 }
 0x10f   :  { %v331_v17 = vrot.slane %v330_v15, 1  ;;  %v368_v18 = vadd.f32 %v367_v16, %v366_v14 }
 0x111   :  { %v332_v19 = vadd.f32 %v331_v17, %v330_v15  ;;  %v369_v20 = vrot.slane %v368_v18, 1 }
 0x113   :  { %333 = vst [vmem:[%s587_s3] sm:$0x1] %v332_v19  ;;  %v370_v21 = vadd.f32 %v369_v20, %v368_v18 }
 0x115   :  { %371 = vst [vmem:[%s588_s4] sm:$0x1] %v370_v21 }

</bundles_post_ra>
